<compile_context>
chip_gen: v5e
topology: v5e:2x2
jax: 0.10.0
libtpu: 0.0.40
codegen_flags: <defaults>
</compile_context>

<pallas_src>
import functools

import jax
import jax.numpy as jnp
import numpy as np
from jax.experimental import pallas as pl
from jax.experimental.pallas import tpu as pltpu


def _vmem_config():
    """Generation-dependent (vmem_limit_bytes, per-buffer tile budget)."""
    cap = None
    try:
        info = pltpu.get_tpu_info()
        cap = getattr(info, "vmem_capacity_bytes", None)
        if cap is None:
            cap = getattr(info, "vmem_size_bytes", None)
    except Exception:
        cap = None
    if cap is None:
        cap = 64 * 1024 * 1024  # conservative fallback: assume v7x-sized VMEM
    if cap >= 128 * 1024 * 1024:         # v5e / v6e
        return 64 * 1024 * 1024, 4 * 1024 * 1024
    return 48 * 1024 * 1024, 4 * 1024 * 1024   # v7x (64 MiB physical)


def _largest_divisor_leq(n, cap):
    cap = max(1, min(cap, n))
    for d in range(cap, 0, -1):
        if n % d == 0:
            return d
    return 1


def _pick_tiles(N, C, HW, itemsize, tile_budget):
    """Pick (n_blk, hw_blk) for the streamed path.  hw_blk is a lane-dense
    multiple of 128 whenever HW allows it; otherwise the full (always-legal)
    extent."""
    if HW % 128 == 0:
        max_hw_elems = max(128, tile_budget // max(1, C * itemsize))
        # Keep the two (C, hw_blk) f32 lane-partial scratches small (<~2 MiB).
        max_hw_scratch = max(128, (2 * 1024 * 1024) // max(1, 2 * C * 4))
        cap = min(max_hw_elems, max_hw_scratch)
        hw_blk = 128
        t = 256
        while t <= HW and t <= cap:
            if HW % t == 0:
                hw_blk = t
            t += 128
    else:
        hw_blk = HW  # full-extent last-dim block is always legal
    max_n = max(1, tile_budget // max(1, C * hw_blk * itemsize))
    n_blk = _largest_divisor_leq(N, max_n)
    return n_blk, hw_blk


# ----------------------------------------------------------------------------
# Fused path: whole tensor resident in VMEM, exact two-pass stats + apply.
# ----------------------------------------------------------------------------
def _fused_kernel(x_ref, o_ref, *, n_total):
    x = x_ref[...].astype(jnp.float32)                               # (N,C,HW)
    mean = jnp.sum(jnp.sum(x, axis=0), axis=-1, keepdims=True) / n_total  # (C,1)
    xc = x - mean
    var = (jnp.sum(jnp.sum(xc * xc, axis=0), axis=-1, keepdims=True)
           / (n_total - 1.0))                                        # (C,1)
    scale = 1.0 / (jnp.sqrt(jnp.maximum(var, 0.0)) + 1e-6)
    o_ref[...] = (scale * xc).astype(o_ref.dtype)


# ----------------------------------------------------------------------------
# Streamed path, pass 1: per-N-block shifted partial sums (megacore parallel).
# ----------------------------------------------------------------------------
def _stats_kernel(x_ref, shift_out, s_out, q_out,
                  shift_sc, sum_sc, sumsq_sc, *, inv_tile_count):
    j = pl.program_id(1)

    x = x_ref[...].astype(jnp.float32)                    # (n_blk, C, hw_blk)

    @pl.when(j == 0)
    def _init():
        # Cheap per-(N-block, channel) shift = mean of the first tile.  Keeps
        # the shifted one-pass sums well-conditioned (no cancellation blow-up).
        shift_sc[...] = (jnp.sum(jnp.sum(x, axis=0), axis=-1, keepdims=True)
                         * inv_tile_count)                # (C, 1)
        sum_sc[...] = jnp.zeros_like(sum_sc)
        sumsq_sc[...] = jnp.zeros_like(sumsq_sc)

    xc = x - shift_sc[...]                                # broadcast (C,1)
    # Deferred cross-lane reduction: accumulate lane partials every step, do
    # the XLU axis=-1 reduce only once in the finalize.
    sum_sc[...] += jnp.sum(xc, axis=0)                    # (C, hw_blk)
    sumsq_sc[...] += jnp.sum(xc * xc, axis=0)             # (C, hw_blk)

    @pl.when(j == pl.num_programs(1) - 1)
    def _finalize():
        shift_out[...] = shift_sc[...]
        s_out[...] = jnp.sum(sum_sc[...], axis=-1, keepdims=True)
        q_out[...] = jnp.sum(sumsq_sc[...], axis=-1, keepdims=True)


# ----------------------------------------------------------------------------
# Streamed path, pass 2: h = scale * (x + loc).
# ----------------------------------------------------------------------------
def _apply_kernel(loc_ref, scale_ref, x_ref, o_ref):
    x = x_ref[...].astype(jnp.float32)                    # (n_blk, C, hw_blk)
    o_ref[...] = (scale_ref[...] * (x + loc_ref[...])).astype(o_ref.dtype)


def actnorm_forward(x, *, force_streamed=False, _tile_budget_override=None):
    """ActNorm forward (first call: data-dependent init, then affine).

    x: (N, C, H, W), NCHW like the PyTorch module.
    """
    N, C, H, W = x.shape
    HW = H * W
    L = N * HW
    itemsize = jnp.dtype(x.dtype).itemsize
    x3 = x.reshape(N, C, HW)                              # free, contiguous

    vmem_limit, tile_budget = _vmem_config()
    if _tile_budget_override is not None:
        tile_budget = int(_tile_budget_override)

    # ---- Fused, VMEM-resident path for small feature maps -------------------
    fused_need = 2 * N * C * HW * itemsize + 3 * N * C * HW * 4
    if not force_streamed and fused_need <= vmem_limit // 2:
        y3 = pl.pallas_call(
            functools.partial(_fused_kernel, n_total=float(L)),
            out_shape=jax.ShapeDtypeStruct((N, C, HW), x.dtype),
            compiler_params=pltpu.CompilerParams(vmem_limit_bytes=vmem_limit),
        )(x3)
        return y3.reshape(N, C, H, W)

    # ---- Streamed two-pass path ---------------------------------------------
    n_blk, hw_blk = _pick_tiles(N, C, HW, itemsize, tile_budget)
    grid = (N // n_blk, HW // hw_blk)
    Gi = grid[0]

    x_spec = pl.BlockSpec((n_blk, C, hw_blk), lambda i, j: (i, 0, j))
    part_spec = pl.BlockSpec((None, C, 1), lambda i, j: (i, 0, 0))

    # Pass 1: per-N-block shifted partial statistics (parallel over N-blocks).
    shift_p, s_p, q_p = pl.pallas_call(
        functools.partial(_stats_kernel,
                          inv_tile_count=1.0 / float(n_blk * hw_blk)),
        out_shape=(jax.ShapeDtypeStruct((Gi, C, 1), jnp.float32),
                   jax.ShapeDtypeStruct((Gi, C, 1), jnp.float32),
                   jax.ShapeDtypeStruct((Gi, C, 1), jnp.float32)),
        grid=grid,
        in_specs=[x_spec],
        out_specs=(part_spec, part_spec, part_spec),
        scratch_shapes=[pltpu.VMEM((C, 1), jnp.float32),
                        pltpu.VMEM((C, hw_blk), jnp.float32),
                        pltpu.VMEM((C, hw_blk), jnp.float32)],
        compiler_params=pltpu.CompilerParams(
            dimension_semantics=("parallel", "arbitrary"),
            vmem_limit_bytes=vmem_limit),
    )(x3)

    # Tiny exact cross-block combine (group decomposition of the variance),
    # done on (Gi, C, 1) arrays in the wrapper.
    m = float(n_blk * HW)                                  # count per N-block
    mu_i = shift_p + s_p / m                               # per-block means
    m2_i = q_p - (s_p * s_p) / m                           # per-block SSE
    mu = jnp.mean(mu_i, axis=0)                            # (C, 1), equal counts
    m2 = jnp.sum(m2_i + m * jnp.square(mu_i - mu), axis=0)
    var = m2 / float(L - 1)                                # L==1 -> NaN, as torch
    std = jnp.sqrt(jnp.maximum(var, 0.0))
    loc = -mu
    scale = 1.0 / (std + 1e-6)

    # Pass 2: h = scale * (x + loc), streamed tile-by-tile (pipelined).
    cvec_spec = pl.BlockSpec((C, 1), lambda i, j: (0, 0))
    y3 = pl.pallas_call(
        _apply_kernel,
        out_shape=jax.ShapeDtypeStruct((N, C, HW), x.dtype),
        grid=grid,
        in_specs=[cvec_spec, cvec_spec, x_spec],
        out_specs=x_spec,
        compiler_params=pltpu.CompilerParams(
            dimension_semantics=("parallel", "parallel"),
            vmem_limit_bytes=vmem_limit),
    )(loc, scale, x3)

    return y3.reshape(N, C, H, W)


def actnorm_reference(x):
    """Pure-JAX reference mirroring the PyTorch module's first forward call."""
    N, C, H, W = x.shape
    flat = jnp.transpose(x, (1, 0, 2, 3)).reshape(C, -1)
    mean = jnp.mean(flat, axis=1).reshape(1, C, 1, 1)
    std = jnp.std(flat, axis=1, ddof=1).reshape(1, C, 1, 1)
    loc = -mean
    scale = 1.0 / (std + 1e-6)
    return scale * (x + loc)


if __name__ == "__main__":
    key = jax.random.PRNGKey(0)
    # Small NCHW feature map consistent with the module.
    N, C, H, W = 2, 4, 16, 16
    x = jax.random.normal(key, (N, C, H, W), dtype=jnp.float32) * 3.0 + 1.5

    # Parameters from __init__ (overwritten by the data-dependent init on the
    # first forward call, exactly as in the PyTorch module).
    loc_param = jnp.zeros((1, C, 1, 1), jnp.float32)      # noqa: F841
    scale_param = jnp.ones((1, C, 1, 1), jnp.float32)     # noqa: F841

    # Default path for this size: fused, VMEM-resident kernel.
    out = actnorm_forward(x)
    out = jax.block_until_ready(out)
    ref = actnorm_reference(x)
    assert out.shape == (N, C, H, W)
    assert out.dtype == x.dtype
    np.testing.assert_allclose(np.asarray(out), np.asarray(ref),
                               rtol=1e-5, atol=1e-5)

    # Also exercise the streamed two-pass path (megacore-parallel stats) with a
    # forced tiny tile budget so multiple grid steps / N-blocks are taken.
    N2, C2, H2, W2 = 4, 8, 32, 32
    x2 = (jax.random.normal(jax.random.PRNGKey(0), (N2, C2, H2, W2),
                            dtype=jnp.float32) * 2.0 - 0.5)
    out2 = actnorm_forward(x2, force_streamed=True,
                           _tile_budget_override=8 * 1024)
    out2 = jax.block_until_ready(out2)
    ref2 = actnorm_reference(x2)
    np.testing.assert_allclose(np.asarray(out2), np.asarray(ref2),
                               rtol=3e-5, atol=3e-5)

    print("KERNEL_OK")
</pallas_src>

<mosaic_0001>
module attributes {stable_mosaic.version = 11 : i64} {
  func.func @_fused_kernel(%arg0: memref<2x4x256xf32, #tpu.memory_space<vmem>>, %arg1: memref<2x4x256xf32, #tpu.memory_space<vmem>>) attributes {dimension_semantics = [], scalar_prefetch = 0 : i64, scratch_operands = 0 : i64, tpu.core_type = #tpu.core_type<tc>} {
    %c0 = arith.constant 0 : index
    %c0_0 = arith.constant 0 : index
    %c0_1 = arith.constant 0 : index
    %0 = vector.load %arg0[%c0, %c0_0, %c0_1] : memref<2x4x256xf32, #tpu.memory_space<vmem>>, vector<2x4x256xf32>
    %cst = arith.constant dense<0.000000e+00> : vector<4x256xf32>
    %1 = vector.multi_reduction <add>, %0, %cst [0] : vector<2x4x256xf32> to vector<4x256xf32>
    %cst_2 = arith.constant dense<0.000000e+00> : vector<4xf32>
    %2 = vector.multi_reduction <add>, %1, %cst_2 [1] : vector<4x256xf32> to vector<4xf32>
    %3 = vector.shape_cast %2 : vector<4xf32> to vector<4x1xf32>
    %cst_3 = arith.constant 5.120000e+02 : f32
    %4 = vector.broadcast %cst_3 : f32 to vector<4x1xf32>
    %5 = arith.divf %3, %4 : vector<4x1xf32>
    %6 = vector.shape_cast %5 : vector<4x1xf32> to vector<1x4x1xf32>
    %7 = vector.broadcast %6 : vector<1x4x1xf32> to vector<2x4x256xf32>
    %8 = arith.subf %0, %7 : vector<2x4x256xf32>
    %9 = arith.mulf %8, %8 : vector<2x4x256xf32>
    %cst_4 = arith.constant dense<0.000000e+00> : vector<4x256xf32>
    %10 = vector.multi_reduction <add>, %9, %cst_4 [0] : vector<2x4x256xf32> to vector<4x256xf32>
    %cst_5 = arith.constant dense<0.000000e+00> : vector<4xf32>
    %11 = vector.multi_reduction <add>, %10, %cst_5 [1] : vector<4x256xf32> to vector<4xf32>
    %12 = vector.shape_cast %11 : vector<4xf32> to vector<4x1xf32>
    %cst_6 = arith.constant 5.110000e+02 : f32
    %13 = vector.broadcast %cst_6 : f32 to vector<4x1xf32>
    %14 = arith.divf %12, %13 : vector<4x1xf32>
    %cst_7 = arith.constant 0.000000e+00 : f32
    %15 = vector.broadcast %cst_7 : f32 to vector<4x1xf32>
    %16 = arith.maximumf %14, %15 : vector<4x1xf32>
    %17 = math.sqrt %16 : vector<4x1xf32>
    %cst_8 = arith.constant 9.99999997E-7 : f32
    %18 = vector.broadcast %cst_8 : f32 to vector<4x1xf32>
    %19 = arith.addf %17, %18 : vector<4x1xf32>
    %cst_9 = arith.constant 1.000000e+00 : f32
    %20 = vector.broadcast %cst_9 : f32 to vector<4x1xf32>
    %21 = arith.divf %20, %19 : vector<4x1xf32>
    %22 = vector.shape_cast %21 : vector<4x1xf32> to vector<1x4x1xf32>
    %23 = vector.broadcast %22 : vector<1x4x1xf32> to vector<2x4x256xf32>
    %24 = arith.mulf %23, %8 : vector<2x4x256xf32>
    %c0_10 = arith.constant 0 : index
    %c0_11 = arith.constant 0 : index
    %c0_12 = arith.constant 0 : index
    %25 = vector.load %arg1[%c0_10, %c0_11, %c0_12] : memref<2x4x256xf32, #tpu.memory_space<vmem>>, vector<2x4x256xf32>
    tpu.vector_store %arg1[%c0_10, %c0_11, %c0_12], %24 {strides = array<i32>} : memref<2x4x256xf32, #tpu.memory_space<vmem>>, vector<2x4x256xf32>,
    return
  }
}

</mosaic_0001>

<bundles_post_ra>
// kernel: tpu_custom_call.1
= control target key start
LH: loop header
LB: loop body
LE: loop exit
PB: predicated region body
PF: predicated region fallthrough
CT: control target
= control target key end

     0   :  { %6 = vsyncpa [#allocation3], 0  ;;  %s289_s0 = inlined_call_operand.hbm [shape: f32[2,4,256], index: 0, kind: input, shape index: {}]   ;;  %s290_s1 = inlined_call_operand.hbm [shape: f32[2,4,256], index: 1, kind: output, shape index: {}]  }
   0x1   :  { %7 = vsyncpa [#allocation4], 0  ;;  %s12_s8 = sshll.u32 %s289_s0, 4  ;;  %s246_s9 = smov [#allocation2]   ;;  %s13_s8 = int_to_ptr.hbm [resolvable:$true] %s12_s8 }
   0x2   :  { %s14_s10 = sshll.u32 %s246_s9, 4  ;;  %s247_s11 = smov 128   ;;  %s15_s10 = int_to_ptr.vmem [resolvable:$true] %s14_s10 }
   0x3   :  { %s248_s12 = smov 8  }
   0x4   :  { %20 = dma.hbm_to_vmem [thread:$0]  %s13_s8, 256, %s15_s10, [#allocation3], %s247_s11, %s247_s11, %s248_s12  }
   0x5   :  { %242 = dma.done.wait [#allocation3], 256  }
   0x6   :  { %243 = vsyncadd [#allocation3], 4294967040  ;;  %v25_v0 = vld [vmem:[#allocation2] sm:$0xff]  ;;  %v26_v1 = vld [vmem:[#allocation2 + $0x8] sm:$0xff]  ;;  %vm40_vm0 = vcmask 1043456   ;;  %v249_v15 = vmov 512.0  }
   0x7   :  { %29 = vst [vmem:[#allocation1] ss:$2 sm:$0xff] %v25_v0  ;;  %186 = vrcp.f32 %v249_v15  ;;  %v250_v21 = vmov 839922192   ;;  %v251_v45 = vmov 511.0   ;;  %s252_s0 = smov [#allocation5]  }
   0x8   :  { %33 = vst [vmem:[#allocation1 + $0x10] ss:$2 sm:$0xff] %v26_v1  ;;  %v62_v22 = vunpack.c.l.s4 %v250_v21  ;;  %188 = vrcp.f32 %v251_v45  ;;  %s164_s13 = sshll.u32 %s252_s0, 4  ;;  %s166_s16 = sshll.u32 %s290_s1, 4  ;;  %s165_s13 = int_to_ptr.vmem [resolvable:$true] %s164_s13  ;;  %s167_s16 = int_to_ptr.hbm [resolvable:$true] %s166_s16 }
   0xa   :  { %v63_v24 = vunpack.c.0.s8 %v62_v22 }
   0xd   :  { %v187_v16 = vpop.eup %186 }
   0xe   :  { %v30_v2 = vld.sshfl [vmem:[#allocation1] sm:$0xff pattern:$0x75316420]  ;;  %v31_v3 = vld.sshfl [vmem:[#allocation1 + $0x8] sm:$0xff pattern:$0x75316420]  ;;  %vm57_vm1 = vweird.f32 %v187_v16  ;;  %v189_v46 = vpop.eup %188 }
   0xf   :  { %v34_v4 = vld.sshfl [vmem:[#allocation1 + $0x10] sm:$0xff pattern:$0x75316420]  ;;  %v35_v5 = vld.sshfl [vmem:[#allocation1 + $0x18] sm:$0xff pattern:$0x75316420]  ;;  %vm99_vm2 = vweird.f32 %v189_v46 }
  0x10   :  { %v41_v6 = vsel %vm40_vm0, %v30_v2, 0.0  ;;  %v42_v7 = vsel %vm40_vm0, %v34_v4, 0.0  ;;  %v44_v8 = vsel %vm40_vm0, %v31_v3, 0.0  ;;  %v45_v9 = vsel %vm40_vm0, %v35_v5, 0.0 }
  0x11   :  { %v43_v10 = vadd.f32 %v42_v7, %v41_v6  ;;  %v46_v11 = vadd.f32 %v45_v9, %v44_v8  ;;  %v53_v17 = vmul.f32 512.0, %v187_v16  ;;  %v95_v47 = vmul.f32 511.0, %v189_v46 }
  0x13   :  { %v47_v12 = vsel %vm40_vm0, %v43_v10, 0.0  ;;  %v48_v13 = vsel %vm40_vm0, %v46_v11, 0.0  ;;  %v54_v18 = vsub.f32 1.0, %v53_v17  ;;  %v96_v48 = vsub.f32 1.0, %v95_v47 }
  0x14   :  { %v49_v14 = vadd.f32 %v48_v13, %v47_v12 }
  0x15   :  { %v55_v19 = vmul.f32 %v187_v16, %v54_v18  ;;  %v97_v49 = vmul.f32 %v189_v46, %v96_v48 }
  0x16   :  { %50 = vadd.xlane.f32.xlu0 %v49_v14 }
  0x17   :  { %v56_v20 = vadd.f32 %v187_v16, %v55_v19  ;;  %v98_v50 = vadd.f32 %v189_v46, %v97_v49 }
  0x19   :  { %v58_v23 = vsel %vm57_vm1, %v187_v16, %v56_v20  ;;  %v100_v51 = vsel %vm99_vm2, %v189_v46, %v98_v50 }
  0x89   :  { %v51_v25 = vpop.xlane.xlu0 %50 }
  0x8a   :  { %v59_v26 = vmul.f32 %v58_v23, %v51_v25 }
  0x8c   :  { %v64_v27 = vperm.slane %v59_v26, %v63_v24 }
  0x8e   :  { %v66_v28 = vsub.f32 %v25_v0, %v64_v27  ;;  %v67_v29 = vsub.f32 %v26_v1, %v64_v27 }
  0x90   :  { %v68_v30 = vmul.f32 %v66_v28, %v66_v28  ;;  %v69_v31 = vmul.f32 %v67_v29, %v67_v29 }
  0x92   :  { %72 = vst [vmem:[#allocation1] ss:$2 sm:$0xff] %v68_v30 }
  0x93   :  { %76 = vst [vmem:[#allocation1 + $0x10] ss:$2 sm:$0xff] %v69_v31 }
  0x99   :  { %v73_v32 = vld.sshfl [vmem:[#allocation1] sm:$0xff pattern:$0x75316420]  ;;  %v74_v33 = vld.sshfl [vmem:[#allocation1 + $0x8] sm:$0xff pattern:$0x75316420] }
  0x9a   :  { %v77_v34 = vld.sshfl [vmem:[#allocation1 + $0x10] sm:$0xff pattern:$0x75316420]  ;;  %v78_v35 = vld.sshfl [vmem:[#allocation1 + $0x18] sm:$0xff pattern:$0x75316420] }
  0x9b   :  { %v83_v36 = vsel %vm40_vm0, %v73_v32, 0.0  ;;  %v84_v37 = vsel %vm40_vm0, %v77_v34, 0.0  ;;  %v86_v38 = vsel %vm40_vm0, %v74_v33, 0.0  ;;  %v87_v39 = vsel %vm40_vm0, %v78_v35, 0.0  ;;  %133 = vst [vmem:[#allocation1] ss:$2 sm:$0xff] %v66_v28 }
  0x9c   :  { %v85_v40 = vadd.f32 %v84_v37, %v83_v36  ;;  %v88_v41 = vadd.f32 %v87_v39, %v86_v38  ;;  %137 = vst [vmem:[#allocation1 + $0x10] ss:$2 sm:$0xff] %v67_v29 }
  0x9e   :  { %v89_v42 = vsel %vm40_vm0, %v85_v40, 0.0  ;;  %v90_v43 = vsel %vm40_vm0, %v88_v41, 0.0 }
  0x9f   :  { %v91_v44 = vadd.f32 %v90_v43, %v89_v42 }
  0xa1   :  { %92 = vadd.xlane.f32.xlu0 %v91_v44 }
  0xa2   :  { %v135_v12 = vld.sshfl [vmem:[#allocation1 + $0x8] sm:$0xff pattern:$0x75316420]  ;;  %v134_v14 = vld.sshfl [vmem:[#allocation1] sm:$0xff pattern:$0x75316420] }
  0xa3   :  { %v139_v13 = vld.sshfl [vmem:[#allocation1 + $0x18] sm:$0xff pattern:$0x75316420]  ;;  %v138_v17 = vld.sshfl [vmem:[#allocation1 + $0x10] sm:$0xff pattern:$0x75316420] }
 0x114   :  { %v93_v52 = vpop.xlane.xlu0 %92 }
 0x115   :  { %v101_v53 = vmul.f32 %v100_v51, %v93_v52 }
 0x117   :  { %v102_v54 = vmax.f32 %v101_v53, 0.0 }
 0x119   :  { %190 = vrsqrt.f32 %v102_v54  ;;  %vm110_vm3 = vcmp.eq.f32.partialorder %v102_v54, inf  ;;  %v113_v62 = vand.u32 2147483648, %v102_v54  ;;  %vm112_vm4 = vcmp.eq.f32.partialorder %v102_v54, 0.0 }
 0x11f   :  { %v191_v55 = vpop.eup %190 }
 0x120   :  { %v104_v56 = vmul.f32 %v191_v55, %v102_v54 }
 0x122   :  { %v105_v57 = vmul.f32 %v191_v55, %v104_v56 }
 0x124   :  { %v106_v58 = vmul.f32 0.5, %v105_v57 }
 0x126   :  { %v107_v59 = vsub.f32 1.5, %v106_v58 }
 0x128   :  { %v108_v60 = vmul.f32 %v191_v55, %v107_v59 }
 0x12a   :  { %v109_v61 = vmul.f32 %v108_v60, %v102_v54 }
 0x12c   :  { %v111_v63 = vsel %vm110_vm3, %v102_v54, %v109_v61 }
 0x12d   :  { %v114_v0 = vsel %vm112_vm4, %v113_v62, %v111_v63 }
 0x12e   :  { %v115_v1 = vadd.f32 1e-06, %v114_v0 }
 0x130   :  { %192 = vrcp.f32 %v115_v1  ;;  %v127_v5 = vand.u32 2147483648, %v115_v1  ;;  %v125_v7 = vand.u32 2147483647, %v115_v1  ;;  %vm121_vm6 = vweird.f32 %v115_v1 }
 0x132   :  { %v128_v9 = vor.u32 1.1754944e-38, %v127_v5  ;;  %vm126_vm8 = vcmp.eq.f32.partialorder %v125_v7, 8.507059e+37 }
 0x136   :  { %v193_v2 = vpop.eup %192 }
 0x137   :  { %v117_v3 = vmul.f32 %v193_v2, %v115_v1  ;;  %vm122_vm5 = vweird.f32 %v193_v2 }
 0x138   :  { %vm123_vm7 = vmor %vm121_vm6, %vm122_vm5 }
 0x139   :  { %v118_v4 = vsub.f32 1.0, %v117_v3 }
 0x13b   :  { %v119_v6 = vmul.f32 %v193_v2, %v118_v4 }
 0x13d   :  { %v120_v8 = vadd.f32 %v193_v2, %v119_v6 }
 0x13f   :  { %v124_v10 = vsel %vm123_vm7, %v193_v2, %v120_v8 }
 0x140   :  { %v129_v11 = vsel %vm126_vm8, %v128_v9, %v124_v10 }
 0x141   :  { %v145_v15 = vmul.f32 %v135_v12, %v129_v11  ;;  %v147_v16 = vmul.f32 %v139_v13, %v129_v11  ;;  %v144_v18 = vmul.f32 %v134_v14, %v129_v11  ;;  %v146_v19 = vmul.f32 %v138_v17, %v129_v11 }
 0x143   :  { %v152_v20 = vrot.slane %v145_v15, 4  ;;  %v153_v21 = vrot.slane %v147_v16, 4 }
 0x145   :  { %v154_v22 = vsel %vm40_vm0, %v144_v18, %v152_v20  ;;  %v155_v23 = vsel %vm40_vm0, %v146_v19, %v153_v21 }
 0x146   :  { %158 = vst [vmem:[#allocation5] sm:$0xff] %v154_v22 }
 0x147   :  { %159 = vst [vmem:[#allocation5 + $0x8] sm:$0xff] %v155_v23 }
 0x148   :  { %172 = dma.vmem_to_hbm [thread:$0]  %s165_s13, 256, %s167_s16, [#allocation4], %s247_s11, %s247_s11, %s248_s12  }
 0x149   :  { %244 = dma.done.wait [#allocation4], 256  }
 0x14a   :  { %245 = vsyncadd [#allocation4], 4294967040 }
 0x14b   :  { %177 = vsyncpa [#allocation3], 1 }
 0x14c   :  { %178 = vsyncpa [#allocation4], 1 }

</bundles_post_ra>
